<compile_context>
chip_gen: v6e
topology: v6e:2x2x1
jax: 0.10.0
libtpu: 0.0.40
codegen_flags: <defaults>
</compile_context>

<pallas_src>
import math
import numpy as np
import jax
import jax.numpy as jnp
from jax.experimental import pallas as pl
from jax.experimental.pallas import tpu as pltpu

# --- model hyper-parameters -------------------------------------------------------------
D_IN = 16           # input_dim
H = 32              # hidden_dim
H2 = H // 2         # 16
H4 = H // 4         # 8
NUM_LAYERS = 2      # INIT_NUM_LAYERS in the reference file
N_HEADS = 4
LANES = 128

# --- original (PyTorch-style) parameter table: (name, fan_in, weight_shape, bias_shape) --
# Linear weights are stored pre-transposed as [in, out]; out_features==1 heads are stored
# as a [1, in] row.  Biases are [1, out].
LINEAR_SPECS = []
for i in range(NUM_LAYERS):
    fi = D_IN if i == 0 else H
    LINEAR_SPECS.append((f"sh{i}", fi, (fi, H), (1, H)))
LINEAR_SPECS += [
    ("attn_q", H, (H, H), (1, H)),     # kept in the param dict; unused (softmax of equal
    ("attn_k", H, (H, H), (1, H)),     # logits is exactly 1/3 regardless of q/k proj)
    ("attn_v", H, (H, H), (1, H)),
    ("attn_o", H, (H, H), (1, H)),
    ("bfb1", 1, (1, H4), (1, H4)), ("bfb2", H4, (H4, H2), (1, H2)),
    ("afb1", 1, (1, H4), (1, H4)), ("afb2", H4, (H4, H2), (1, H2)),
    ("sp1", 2, (2, H4), (1, H4)),  ("sp2", H4, (H4, H2), (1, H2)),   # spread_encoder (dead)
    ("pp1", H, (H, H), (1, H)), ("pp2", H, (H, H2), (1, H2)),
    ("bp1", H, (H, H), (1, H)), ("bp2", H, (H, H2), (1, H2)),
    ("ap1", H, (H, H), (1, H)), ("ap2", H, (H, H2), (1, H2)),
    ("fu1", 3 * H2, (3 * H2, H), (1, H)), ("fu2", H, (H, H2), (1, H2)),
    ("bh1", H, (H, H4), (1, H4)), ("bh2", H4, (1, H4), (1, 1)),
    ("ah1", H, (H, H4), (1, H4)), ("ah2", H4, (1, H4), (1, 1)),
    ("ph1", 2 * H, (2 * H, H), (1, H)), ("ph2", H, (H, H2), (1, H2)), ("ph3", H2, (1, H2), (1, 1)),
    ("r0a", H2 + 3, (H2 + 3, H2), (1, H2)), ("r0b", H2, (1, H2), (1, 1)),
    ("r1a", H2 + 3, (H2 + 3, H2), (1, H2)), ("r1b", H2, (1, H2), (1, 1)),
    ("cf1", H2, (H2, H4), (1, H4)), ("cf2", H4, (H4, 3), (1, 3)),
]


def init_params(key):
    """Deterministic synthetic init (uniform +/- 1/sqrt(fan_in)); not a checkpoint load."""
    params = {}
    keys = jax.random.split(key, len(LINEAR_SPECS))
    for (name, fan_in, w_shape, b_shape), k in zip(LINEAR_SPECS, keys):
        kw, kb = jax.random.split(k)
        bound = 1.0 / math.sqrt(fan_in)
        params[name + "_w"] = jax.random.uniform(kw, w_shape, jnp.float32, -bound, bound)
        params[name + "_b"] = jax.random.uniform(kb, b_shape, jnp.float32, -bound, bound)
    return params


# --- fused parameter slab layout ---------------------------------------------------------
# Each fused matrix occupies an 8-row-aligned block of the [SLAB_ROWS, 128] slab:
# weight at rows [off, off+wr), cols [0, wc); optional bias at row off+wr, cols [0, bw).
_SLAB_SPECS = [
    # name, (weight_rows, weight_cols), bias_width (0 = no bias row)
    ("pre", (D_IN, 3 * H), 3 * H),            # folded: shared-stack + MHA(v,o) + proc stage-1
    ("p2f1", (3 * H, 3 * H2 + H), 3 * H2 + H),  # [block-diag proc stage-2 | fused fu1 pre-act]
    ("fu2", (H, H2), H2),
    ("h1ba", (2 * H2, 2 * H4), 0),            # block-diag(bh1_w[:16], ah1_w[:16])
    ("h1si", (H2, 2 * H4), 2 * H4),           # [bh1_w[16:] | ah1_w[16:]]
    ("h2", (2 * H4, 2), 2),                   # block-diag(bh2^T, ah2^T)
    ("fb1", (2, 2 * H4), 2 * H4),             # [[bfb1,0],[0,afb1]]  (used in VPU form)
    ("fb2", (2 * H4, 2 * H2), 2 * H2),        # block-diag(bfb2, afb2)
    ("ph1", (4 * H2, H), H), ("ph2", (H, H2), H2), ("ph3", (1, H2), 1),
    ("r0a", (H2 + 3, H2), H2), ("r0b", (1, H2), 1),
    ("r1a", (H2 + 3, H2), H2), ("r1b", (1, H2), 1),
    ("cf1", (H2, H4), H4), ("cf2", (H4, 3), 3),
]


def _build_layout():
    layout, off = {}, 0
    for name, (wr, wc), bw in _SLAB_SPECS:
        layout[name] = (off, wr, wc, bw)
        rows = wr + (1 if bw else 0)
        off += ((rows + 7) // 8) * 8
    return layout, off


SLAB_LAYOUT, SLAB_ROWS = _build_layout()      # SLAB_ROWS == 496

OUT_COLS = 2 * H2 + 9 + 3                     # bid_fb(16) | ask_fb(16) | scalars(9) | conf(3) = 44


def _block_diag(*blocks):
    rows = sum(b.shape[0] for b in blocks)
    cols = sum(b.shape[1] for b in blocks)
    out = np.zeros((rows, cols), np.float32)
    r = c = 0
    for blk in blocks:
        br, bc = blk.shape
        out[r:r + br, c:c + bc] = blk
        r += br
        c += bc
    return out


def pack_params(params):
    """Host-side: fold affine chains, fuse same-input Linears, pack into one [SLAB_ROWS,128] slab."""
    p = {k: np.asarray(v, np.float32) for k, v in params.items()}
    z = lambda r, c: np.zeros((r, c), np.float32)
    cat1 = lambda *a: np.concatenate(a, axis=1)

    # ---- fold the fully-affine prefix ----------------------------------------------------
    # shared = sh0(x) - sh1(sh0(x))  (widths match at layer 1 -> residual subtraction)
    I32 = np.eye(H, dtype=np.float32)
    A = p["sh0_w"] @ (I32 - p["sh1_w"])                     # [16, 32]
    c = p["sh0_b"] @ (I32 - p["sh1_w"]) - p["sh1_b"]        # [ 1, 32]
    # degenerate MHA over 3 identical rows: softmax of equal logits is exactly 1/3 per key;
    # keep wsum = fl32((1/3+1/3)+1/3) so the folded path matches the explicit bmm accumulation.
    third = np.float32(1.0 / 3.0)
    wsum = np.float32(np.float32(third + third) + third)
    Av = (p["attn_v_w"] * wsum) @ p["attn_o_w"]                               # [32, 32]
    cv = (p["attn_v_b"] * wsum) @ p["attn_o_w"] + p["attn_o_b"]               # [ 1, 32]
    # processor stage-1 fused across the three identical branch inputs
    Wproc1 = cat1(p["pp1_w"], p["bp1_w"], p["ap1_w"])                         # [32, 96]
    bproc1 = cat1(p["pp1_b"], p["bp1_b"], p["ap1_b"])                         # [ 1, 96]
    W_pre = A @ Av @ Wproc1                                                    # [16, 96]
    b_pre = (c @ Av + cv) @ Wproc1 + bproc1                                    # [ 1, 96]

    # ---- processor stage-2 fused with fusion-layer pre-activation ------------------------
    W_proc2 = _block_diag(p["pp2_w"], p["bp2_w"], p["ap2_w"])                  # [96, 48]
    b_proc2 = cat1(p["pp2_b"], p["bp2_b"], p["ap2_b"])                         # [ 1, 48]
    W_p2f1 = cat1(W_proc2, W_proc2 @ p["fu1_w"])                               # [96, 80]
    b_p2f1 = cat1(b_proc2, b_proc2 @ p["fu1_w"] + p["fu1_b"])                  # [ 1, 80]

    fused = {
        "pre": (W_pre, b_pre),
        "p2f1": (W_p2f1, b_p2f1),
        "fu2": (p["fu2_w"], p["fu2_b"]),
        "h1ba": (_block_diag(p["bh1_w"][:H2], p["ah1_w"][:H2]), None),
        "h1si": (cat1(p["bh1_w"][H2:], p["ah1_w"][H2:]),
                 cat1(p["bh1_b"], p["ah1_b"])),
        "h2": (_block_diag(p["bh2_w"].T, p["ah2_w"].T),
               cat1(p["bh2_b"], p["ah2_b"])),
        "fb1": (np.concatenate([cat1(p["bfb1_w"], z(1, H4)),
                                cat1(z(1, H4), p["afb1_w"])], axis=0),
                cat1(p["bfb1_b"], p["afb1_b"])),
        "fb2": (_block_diag(p["bfb2_w"], p["afb2_w"]),
                cat1(p["bfb2_b"], p["afb2_b"])),
        "ph1": (p["ph1_w"], p["ph1_b"]),
        "ph2": (p["ph2_w"], p["ph2_b"]),
        "ph3": (p["ph3_w"], p["ph3_b"]),
        "r0a": (p["r0a_w"], p["r0a_b"]), "r0b": (p["r0b_w"], p["r0b_b"]),
        "r1a": (p["r1a_w"], p["r1a_b"]), "r1b": (p["r1b_w"], p["r1b_b"]),
        "cf1": (p["cf1_w"], p["cf1_b"]),
        "cf2": (p["cf2_w"], p["cf2_b"]),
    }

    slab = np.zeros((SLAB_ROWS, LANES), np.float32)
    for name, (off, wr, wc, bw) in SLAB_LAYOUT.items():
        w, b = fused[name]
        assert w.shape == (wr, wc), (name, w.shape, (wr, wc))
        slab[off:off + wr, :wc] = w
        if bw:
            slab[off + wr, :bw] = np.asarray(b, np.float32).reshape(-1)[:bw]
    return jnp.asarray(slab)


# --- the kernel: entire forward pass on one batch tile ------------------------------------
def ensemble_kernel(x_ref, slab_ref, out_ref):
    def w(name):
        off, wr, wc, _ = SLAB_LAYOUT[name]
        return slab_ref[off:off + wr, 0:wc]

    def b(name):
        off, wr, wc, bw = SLAB_LAYOUT[name]
        return slab_ref[off + wr:off + wr + 1, 0:bw]

    def dot(h, m):
        return jnp.dot(h, m, preferred_element_type=jnp.float32)

    def lin(h, name):
        return dot(h, w(name)) + b(name)

    relu = lambda t: jnp.maximum(t, 0.0)

    x = x_ref[...]

    # ---- folded prefix: shared stack -> degenerate MHA -> processor stage-1 ----
    h96 = relu(lin(x, "pre"))                       # [TB, 96]

    # ---- processor stage-2 fused with fusion-layer pre-activation ----
    y = lin(h96, "p2f1")                            # [TB, 80]
    feats = y[:, 0:3 * H2]                          # [TB, 48] = [price_f | bid_f | ask_f]
    price_f = feats[:, 0:H2]
    ba_f = feats[:, H2:3 * H2]                      # [TB, 32] = [bid_f | ask_f]
    si = lin(relu(y[:, 3 * H2:3 * H2 + H]), "fu2")  # shared_info, [TB, 16]  (Dropout = id)

    # ---- bid/ask stage-1 heads (fused block-diagonal, split-weight form) ----
    h_heads = relu(dot(ba_f, w("h1ba")) + lin(si, "h1si"))   # [TB, 16]
    ba_s1 = lin(h_heads, "h2")                      # [TB, 2] = [bid_s1 | ask_s1]
    bid_s1 = ba_s1[:, 0:1]
    ask_s1 = ba_s1[:, 1:2]

    # ---- feedback MLPs: K=2 stage on the VPU, stage-2 as one block-diag matmul ----
    fb1w, fb1b = w("fb1"), b("fb1")
    fb1_pre = bid_s1 * fb1w[0:1, :] + ask_s1 * fb1w[1:2, :] + fb1b
    fbs = lin(relu(fb1_pre), "fb2")                 # [TB, 32] = [bid_fb | ask_fb]
    # spread_encoder output never reaches any returned value in the reference: omitted.

    # ---- enhanced price head: cat(price_f, si, bid_fb, ask_fb) via split weights ----
    ph1w, ph1b = w("ph1"), b("ph1")
    ph = relu(dot(price_f, ph1w[0:H2, :])
              + dot(si, ph1w[H2:2 * H2, :])
              + dot(fbs, ph1w[2 * H2:4 * H2, :])
              + ph1b)
    ph = relu(lin(ph, "ph2"))
    price_enh = jnp.sum(ph * w("ph3"), axis=-1, keepdims=True) + b("ph3")   # [TB, 1]

    # ---- iterative refinement: cat(si, [price, bid, ask]) via split weights ----
    pr = price_enh
    refined = []
    for r in range(2):
        raw, rab = w(f"r{r}a"), b(f"r{r}a")
        rh = relu(dot(si, raw[0:H2, :])
                  + pr * raw[H2:H2 + 1, :]
                  + bid_s1 * raw[H2 + 1:H2 + 2, :]
                  + ask_s1 * raw[H2 + 2:H2 + 3, :]
                  + rab)
        delta = jnp.sum(rh * w(f"r{r}b"), axis=-1, keepdims=True) + b(f"r{r}b")
        pr = price_enh + delta
        refined.append(pr)
    final_price = refined[-1]

    # ---- constraint logic (F.softmax(constraint_weights) is unused in the reference) ----
    bid_viol = relu(bid_s1 - final_price)
    ask_viol = relu(final_price - ask_s1)
    c_price = final_price - 0.1 * (bid_viol + ask_viol)
    c_bid = bid_s1 - 0.1 * bid_viol
    c_ask = ask_s1 + 0.1 * ask_viol

    conf = jax.nn.sigmoid(lin(relu(lin(si, "cf1")), "cf2"))   # [TB, 3]

    # ---- single lane-dense packed output write (scalars assembled as one narrow block) ----
    scalars = jnp.concatenate(
        [c_price, c_bid, c_ask,                 # cols 32:35
         bid_s1, ask_s1, price_enh,             # cols 35:38
         refined[0], refined[1],                # cols 38:40
         bid_viol + ask_viol],                  # col  40
        axis=-1)                                # [TB, 9]
    tb = x.shape[0]
    pad = jnp.zeros((tb, LANES - OUT_COLS), jnp.float32)
    out_ref[...] = jnp.concatenate([fbs, scalars, conf, pad], axis=-1)


# --- wrapper -------------------------------------------------------------------------------
def _choose_tb(B):
    """Batch tile: single step for small batches; >=2 steps (v7x has 2 TCs) and <=1024 rows
    otherwise (keeps intermediates well under the 64 MiB v7x VMEM)."""
    if B <= 256:
        return B
    tb = min(1024, -(-B // 2))          # cdiv(B, 2), capped
    return ((tb + 7) // 8) * 8          # 8-row aligned so padded batches tile cleanly


def ensemble_forward(x, param_slab, training_mode=True, *, tb=None):
    del training_mode  # only controls .detach() in the reference; no forward-value effect
    B, d_in = x.shape
    assert d_in == D_IN
    if tb is None:
        tb = _choose_tb(B)
    tb = max(1, min(tb, B)) if B <= 256 else tb

    # pad the batch to a tile multiple instead of falling back to one giant tile
    B_pad = ((B + tb - 1) // tb) * tb
    x_p = x if B_pad == B else jnp.pad(x, ((0, B_pad - B), (0, 0)))
    grid = (B_pad // tb,)

    out = pl.pallas_call(
        ensemble_kernel,
        out_shape=jax.ShapeDtypeStruct((B_pad, LANES), jnp.float32),
        grid=grid,
        in_specs=[
            pl.BlockSpec((tb, D_IN), lambda i: (i, 0)),
            # one resident ~250 KB param slab, constant index_map (no per-layer DMA)
            pl.BlockSpec((SLAB_ROWS, LANES), lambda i: (0, 0)),
        ],
        out_specs=pl.BlockSpec((tb, LANES), lambda i: (i, 0)),
        compiler_params=pltpu.CompilerParams(
            dimension_semantics=("parallel",),
            vmem_limit_bytes=32 * 1024 * 1024,
        ),
    )(x_p, param_slab)
    out = out[:B]

    bid_fb = out[:, 0:H2]
    ask_fb = out[:, H2:2 * H2]
    c_price = out[:, 32]
    c_bid = out[:, 33]
    c_ask = out[:, 34]
    bid_stage1 = out[:, 35]
    ask_stage1 = out[:, 36]
    price_enhanced = out[:, 37]
    refined = [out[:, 38], out[:, 39]]
    violations = out[:, 40]
    conf = out[:, 41:44]

    # PyTorch MHA over 3 identical query/key/value rows: softmax of equal logits is exactly
    # 1/3 per key; the head-average stays 1/3.
    attention_weights = jnp.full((B, 3, 3), np.float32(1.0 / 3.0), dtype=jnp.float32)

    aux = {
        "bid_stage1": bid_stage1,
        "ask_stage1": ask_stage1,
        "price_enhanced": price_enhanced,
        "price_refined": refined,
        "bid_feedback": bid_fb,
        "ask_feedback": ask_fb,
        "constraint_violations": violations,
    }
    return (c_price, c_bid, c_ask, attention_weights, conf, aux)


if __name__ == "__main__":
    key = jax.random.PRNGKey(0)
    kx, kp = jax.random.split(key)
    B = 8
    x = jax.random.normal(kx, (B, D_IN), dtype=jnp.float32)
    params = init_params(kp)
    param_slab = pack_params(params)

    result = ensemble_forward(x, param_slab, training_mode=True)
    jax.block_until_ready(result)

    cp, cb, ca, attw, conf, aux = result
    assert cp.shape == (B,) and cb.shape == (B,) and ca.shape == (B,)
    assert attw.shape == (B, 3, 3) and conf.shape == (B, 3)
    assert aux["bid_feedback"].shape == (B, H2) and aux["ask_feedback"].shape == (B, H2)
    assert len(aux["price_refined"]) == 2
    print("KERNEL_OK")
</pallas_src>

<mosaic_0001>
module attributes {stable_mosaic.version = 11 : i64} {
  func.func @ensemble_kernel(%arg0: i32, %arg1: memref<8x16xf32, #tpu.memory_space<vmem>>, %arg2: memref<504x128xf32, #tpu.memory_space<vmem>>, %arg3: memref<8x128xf32, #tpu.memory_space<vmem>>) attributes {dimension_semantics = [#tpu.dimension_semantics<parallel>], iteration_bounds = array<i64: 1>, scalar_prefetch = 0 : i64, scratch_operands = 0 : i64, tpu.core_type = #tpu.core_type<tc>, window_params = [{transform_indices = @transform_0, window_bounds = array<i64: 8, 16>}, {pipeline_mode = #tpu.pipeline_mode<synchronous>, transform_indices = @transform_1, window_bounds = array<i64: 504, 128>}, {transform_indices = @transform_2, window_bounds = array<i64: 8, 128>}]} {
    %c0 = arith.constant 0 : index
    %c0_0 = arith.constant 0 : index
    %0 = vector.load %arg1[%c0, %c0_0] : memref<8x16xf32, #tpu.memory_space<vmem>>, vector<8x16xf32>
    %c0_1 = arith.constant 0 : index
    %c0_2 = arith.constant 0 : index
    %1 = vector.load %arg2[%c0_1, %c0_2] : memref<504x128xf32, #tpu.memory_space<vmem>>, vector<16x96xf32>
    %cst = arith.constant dense<0.000000e+00> : vector<8x96xf32>
    %2 = tpu.matmul %0, %1, %cst {dimension_numbers = #tpu.dot_dimension_numbers<[1], [0], [0], [1], [0, 0, 1, 1], [], []>} : vector<8x16xf32>, vector<16x96xf32>, vector<8x96xf32> -> vector<8x96xf32>
    %c16 = arith.constant 16 : index
    %c0_3 = arith.constant 0 : index
    %3 = vector.load %arg2[%c16, %c0_3] : memref<504x128xf32, #tpu.memory_space<vmem>>, vector<1x96xf32>
    %4 = vector.broadcast %3 : vector<1x96xf32> to vector<8x96xf32>
    %5 = arith.addf %2, %4 : vector<8x96xf32>
    %cst_4 = arith.constant 0.000000e+00 : f32
    %6 = vector.broadcast %cst_4 : f32 to vector<8x96xf32>
    %7 = arith.maximumf %5, %6 : vector<8x96xf32>
    %c24 = arith.constant 24 : index
    %c0_5 = arith.constant 0 : index
    %8 = vector.load %arg2[%c24, %c0_5] : memref<504x128xf32, #tpu.memory_space<vmem>>, vector<96x80xf32>
    %cst_6 = arith.constant dense<0.000000e+00> : vector<8x80xf32>
    %9 = tpu.matmul %7, %8, %cst_6 {dimension_numbers = #tpu.dot_dimension_numbers<[1], [0], [0], [1], [0, 0, 1, 1], [], []>} : vector<8x96xf32>, vector<96x80xf32>, vector<8x80xf32> -> vector<8x80xf32>
    %c120 = arith.constant 120 : index
    %c0_7 = arith.constant 0 : index
    %10 = vector.load %arg2[%c120, %c0_7] : memref<504x128xf32, #tpu.memory_space<vmem>>, vector<1x80xf32>
    %11 = vector.broadcast %10 : vector<1x80xf32> to vector<8x80xf32>
    %12 = arith.addf %9, %11 : vector<8x80xf32>
    %13 = vector.extract_strided_slice %12 {offsets = [0, 0], sizes = [8, 48], strides = [1, 1]} : vector<8x80xf32> to vector<8x48xf32>
    %14 = vector.extract_strided_slice %13 {offsets = [0, 0], sizes = [8, 16], strides = [1, 1]} : vector<8x48xf32> to vector<8x16xf32>
    %15 = vector.extract_strided_slice %13 {offsets = [0, 16], sizes = [8, 32], strides = [1, 1]} : vector<8x48xf32> to vector<8x32xf32>
    %16 = vector.extract_strided_slice %12 {offsets = [0, 48], sizes = [8, 32], strides = [1, 1]} : vector<8x80xf32> to vector<8x32xf32>
    %cst_8 = arith.constant 0.000000e+00 : f32
    %17 = vector.broadcast %cst_8 : f32 to vector<8x32xf32>
    %18 = arith.maximumf %16, %17 : vector<8x32xf32>
    %c128 = arith.constant 128 : index
    %c0_9 = arith.constant 0 : index
    %19 = vector.load %arg2[%c128, %c0_9] : memref<504x128xf32, #tpu.memory_space<vmem>>, vector<32x16xf32>
    %cst_10 = arith.constant dense<0.000000e+00> : vector<8x16xf32>
    %20 = tpu.matmul %18, %19, %cst_10 {dimension_numbers = #tpu.dot_dimension_numbers<[1], [0], [0], [1], [0, 0, 1, 1], [], []>} : vector<8x32xf32>, vector<32x16xf32>, vector<8x16xf32> -> vector<8x16xf32>
    %c160 = arith.constant 160 : index
    %c0_11 = arith.constant 0 : index
    %21 = vector.load %arg2[%c160, %c0_11] : memref<504x128xf32, #tpu.memory_space<vmem>>, vector<1x16xf32>
    %22 = vector.broadcast %21 : vector<1x16xf32> to vector<8x16xf32>
    %23 = arith.addf %20, %22 : vector<8x16xf32>
    %c168 = arith.constant 168 : index
    %c0_12 = arith.constant 0 : index
    %24 = vector.load %arg2[%c168, %c0_12] : memref<504x128xf32, #tpu.memory_space<vmem>>, vector<32x16xf32>
    %cst_13 = arith.constant dense<0.000000e+00> : vector<8x16xf32>
    %25 = tpu.matmul %15, %24, %cst_13 {dimension_numbers = #tpu.dot_dimension_numbers<[1], [0], [0], [1], [0, 0, 1, 1], [], []>} : vector<8x32xf32>, vector<32x16xf32>, vector<8x16xf32> -> vector<8x16xf32>
    %c200 = arith.constant 200 : index
    %c0_14 = arith.constant 0 : index
    %26 = vector.load %arg2[%c200, %c0_14] : memref<504x128xf32, #tpu.memory_space<vmem>>, vector<16x16xf32>
    %cst_15 = arith.constant dense<0.000000e+00> : vector<8x16xf32>
    %27 = tpu.matmul %23, %26, %cst_15 {dimension_numbers = #tpu.dot_dimension_numbers<[1], [0], [0], [1], [0, 0, 1, 1], [], []>} : vector<8x16xf32>, vector<16x16xf32>, vector<8x16xf32> -> vector<8x16xf32>
    %c216 = arith.constant 216 : index
    %c0_16 = arith.constant 0 : index
    %28 = vector.load %arg2[%c216, %c0_16] : memref<504x128xf32, #tpu.memory_space<vmem>>, vector<1x16xf32>
    %29 = vector.broadcast %28 : vector<1x16xf32> to vector<8x16xf32>
    %30 = arith.addf %27, %29 : vector<8x16xf32>
    %31 = arith.addf %25, %30 : vector<8x16xf32>
    %cst_17 = arith.constant 0.000000e+00 : f32
    %32 = vector.broadcast %cst_17 : f32 to vector<8x16xf32>
    %33 = arith.maximumf %31, %32 : vector<8x16xf32>
    %c224 = arith.constant 224 : index
    %c0_18 = arith.constant 0 : index
    %34 = vector.load %arg2[%c224, %c0_18] : memref<504x128xf32, #tpu.memory_space<vmem>>, vector<16x2xf32>
    %cst_19 = arith.constant dense<0.000000e+00> : vector<8x2xf32>
    %35 = tpu.matmul %33, %34, %cst_19 {dimension_numbers = #tpu.dot_dimension_numbers<[1], [0], [0], [1], [0, 0, 1, 1], [], []>} : vector<8x16xf32>, vector<16x2xf32>, vector<8x2xf32> -> vector<8x2xf32>
    %c240 = arith.constant 240 : index
    %c0_20 = arith.constant 0 : index
    %36 = vector.load %arg2[%c240, %c0_20] : memref<504x128xf32, #tpu.memory_space<vmem>>, vector<1x2xf32>
    %37 = vector.broadcast %36 : vector<1x2xf32> to vector<8x2xf32>
    %38 = arith.addf %35, %37 : vector<8x2xf32>
    %39 = vector.extract_strided_slice %38 {offsets = [0, 0], sizes = [8, 1], strides = [1, 1]} : vector<8x2xf32> to vector<8x1xf32>
    %40 = vector.extract_strided_slice %38 {offsets = [0, 1], sizes = [8, 1], strides = [1, 1]} : vector<8x2xf32> to vector<8x1xf32>
    %c248 = arith.constant 248 : index
    %c0_21 = arith.constant 0 : index
    %41 = vector.load %arg2[%c248, %c0_21] : memref<504x128xf32, #tpu.memory_space<vmem>>, vector<2x16xf32>
    %c250 = arith.constant 250 : index
    %c0_22 = arith.constant 0 : index
    %42 = vector.load %arg2[%c250, %c0_22] : memref<504x128xf32, #tpu.memory_space<vmem>>, vector<1x16xf32>
    %43 = vector.extract_strided_slice %41 {offsets = [0, 0], sizes = [1, 16], strides = [1, 1]} : vector<2x16xf32> to vector<1x16xf32>
    %44 = vector.broadcast %39 : vector<8x1xf32> to vector<8x16xf32>
    %45 = vector.broadcast %43 : vector<1x16xf32> to vector<8x16xf32>
    %46 = arith.mulf %44, %45 : vector<8x16xf32>
    %47 = vector.extract_strided_slice %41 {offsets = [1, 0], sizes = [1, 16], strides = [1, 1]} : vector<2x16xf32> to vector<1x16xf32>
    %48 = vector.broadcast %40 : vector<8x1xf32> to vector<8x16xf32>
    %49 = vector.broadcast %47 : vector<1x16xf32> to vector<8x16xf32>
    %50 = arith.mulf %48, %49 : vector<8x16xf32>
    %51 = arith.addf %46, %50 : vector<8x16xf32>
    %52 = vector.broadcast %42 : vector<1x16xf32> to vector<8x16xf32>
    %53 = arith.addf %51, %52 : vector<8x16xf32>
    %cst_23 = arith.constant 0.000000e+00 : f32
    %54 = vector.broadcast %cst_23 : f32 to vector<8x16xf32>
    %55 = arith.maximumf %53, %54 : vector<8x16xf32>
    %c256 = arith.constant 256 : index
    %c0_24 = arith.constant 0 : index
    %56 = vector.load %arg2[%c256, %c0_24] : memref<504x128xf32, #tpu.memory_space<vmem>>, vector<16x32xf32>
    %cst_25 = arith.constant dense<0.000000e+00> : vector<8x32xf32>
    %57 = tpu.matmul %55, %56, %cst_25 {dimension_numbers = #tpu.dot_dimension_numbers<[1], [0], [0], [1], [0, 0, 1, 1], [], []>} : vector<8x16xf32>, vector<16x32xf32>, vector<8x32xf32> -> vector<8x32xf32>
    %c272 = arith.constant 272 : index
    %c0_26 = arith.constant 0 : index
    %58 = vector.load %arg2[%c272, %c0_26] : memref<504x128xf32, #tpu.memory_space<vmem>>, vector<1x32xf32>
    %59 = vector.broadcast %58 : vector<1x32xf32> to vector<8x32xf32>
    %60 = arith.addf %57, %59 : vector<8x32xf32>
    %c280 = arith.constant 280 : index
    %c0_27 = arith.constant 0 : index
    %61 = vector.load %arg2[%c280, %c0_27] : memref<504x128xf32, #tpu.memory_space<vmem>>, vector<64x32xf32>
    %c344 = arith.constant 344 : index
    %c0_28 = arith.constant 0 : index
    %62 = vector.load %arg2[%c344, %c0_28] : memref<504x128xf32, #tpu.memory_space<vmem>>, vector<1x32xf32>
    %63 = vector.extract_strided_slice %61 {offsets = [0, 0], sizes = [16, 32], strides = [1, 1]} : vector<64x32xf32> to vector<16x32xf32>
    %cst_29 = arith.constant dense<0.000000e+00> : vector<8x32xf32>
    %64 = tpu.matmul %14, %63, %cst_29 {dimension_numbers = #tpu.dot_dimension_numbers<[1], [0], [0], [1], [0, 0, 1, 1], [], []>} : vector<8x16xf32>, vector<16x32xf32>, vector<8x32xf32> -> vector<8x32xf32>
    %65 = vector.extract_strided_slice %61 {offsets = [16, 0], sizes = [16, 32], strides = [1, 1]} : vector<64x32xf32> to vector<16x32xf32>
    %cst_30 = arith.constant dense<0.000000e+00> : vector<8x32xf32>
    %66 = tpu.matmul %23, %65, %cst_30 {dimension_numbers = #tpu.dot_dimension_numbers<[1], [0], [0], [1], [0, 0, 1, 1], [], []>} : vector<8x16xf32>, vector<16x32xf32>, vector<8x32xf32> -> vector<8x32xf32>
    %67 = arith.addf %64, %66 : vector<8x32xf32>
    %68 = vector.extract_strided_slice %61 {offsets = [32, 0], sizes = [32, 32], strides = [1, 1]} : vector<64x32xf32> to vector<32x32xf32>
    %cst_31 = arith.constant dense<0.000000e+00> : vector<8x32xf32>
    %69 = tpu.matmul %60, %68, %cst_31 {dimension_numbers = #tpu.dot_dimension_numbers<[1], [0], [0], [1], [0, 0, 1, 1], [], []>} : vector<8x32xf32>, vector<32x32xf32>, vector<8x32xf32> -> vector<8x32xf32>
    %70 = arith.addf %67, %69 : vector<8x32xf32>
    %71 = vector.broadcast %62 : vector<1x32xf32> to vector<8x32xf32>
    %72 = arith.addf %70, %71 : vector<8x32xf32>
    %cst_32 = arith.constant 0.000000e+00 : f32
    %73 = vector.broadcast %cst_32 : f32 to vector<8x32xf32>
    %74 = arith.maximumf %72, %73 : vector<8x32xf32>
    %c352 = arith.constant 352 : index
    %c0_33 = arith.constant 0 : index
    %75 = vector.load %arg2[%c352, %c0_33] : memref<504x128xf32, #tpu.memory_space<vmem>>, vector<32x16xf32>
    %cst_34 = arith.constant dense<0.000000e+00> : vector<8x16xf32>
    %76 = tpu.matmul %74, %75, %cst_34 {dimension_numbers = #tpu.dot_dimension_numbers<[1], [0], [0], [1], [0, 0, 1, 1], [], []>} : vector<8x32xf32>, vector<32x16xf32>, vector<8x16xf32> -> vector<8x16xf32>
    %c384 = arith.constant 384 : index
    %c0_35 = arith.constant 0 : index
    %77 = vector.load %arg2[%c384, %c0_35] : memref<504x128xf32, #tpu.memory_space<vmem>>, vector<1x16xf32>
    %78 = vector.broadcast %77 : vector<1x16xf32> to vector<8x16xf32>
    %79 = arith.addf %76, %78 : vector<8x16xf32>
    %cst_36 = arith.constant 0.000000e+00 : f32
    %80 = vector.broadcast %cst_36 : f32 to vector<8x16xf32>
    %81 = arith.maximumf %79, %80 : vector<8x16xf32>
    %c392 = arith.constant 392 : index
    %c0_37 = arith.constant 0 : index
    %82 = vector.load %arg2[%c392, %c0_37] : memref<504x128xf32, #tpu.memory_space<vmem>>, vector<1x16xf32>
    %83 = vector.broadcast %82 : vector<1x16xf32> to vector<8x16xf32>
    %84 = arith.mulf %81, %83 : vector<8x16xf32>
    %cst_38 = arith.constant dense<0.000000e+00> : vector<8xf32>
    %85 = vector.multi_reduction <add>, %84, %cst_38 [1] : vector<8x16xf32> to vector<8xf32>
    %86 = vector.shape_cast %85 : vector<8xf32> to vector<8x1xf32>
    %c393 = arith.constant 393 : index
    %c0_39 = arith.constant 0 : index
    %87 = vector.load %arg2[%c393, %c0_39] : memref<504x128xf32, #tpu.memory_space<vmem>>, vector<1x1xf32>
    %88 = vector.broadcast %87 : vector<1x1xf32> to vector<8x1xf32>
    %89 = arith.addf %86, %88 : vector<8x1xf32>
    %c400 = arith.constant 400 : index
    %c0_40 = arith.constant 0 : index
    %90 = vector.load %arg2[%c400, %c0_40] : memref<504x128xf32, #tpu.memory_space<vmem>>, vector<19x16xf32>
    %c419 = arith.constant 419 : index
    %c0_41 = arith.constant 0 : index
    %91 = vector.load %arg2[%c419, %c0_41] : memref<504x128xf32, #tpu.memory_space<vmem>>, vector<1x16xf32>
    %92 = vector.extract_strided_slice %90 {offsets = [0, 0], sizes = [16, 16], strides = [1, 1]} : vector<19x16xf32> to vector<16x16xf32>
    %cst_42 = arith.constant dense<0.000000e+00> : vector<8x16xf32>
    %93 = tpu.matmul %23, %92, %cst_42 {dimension_numbers = #tpu.dot_dimension_numbers<[1], [0], [0], [1], [0, 0, 1, 1], [], []>} : vector<8x16xf32>, vector<16x16xf32>, vector<8x16xf32> -> vector<8x16xf32>
    %94 = vector.extract_strided_slice %90 {offsets = [16, 0], sizes = [1, 16], strides = [1, 1]} : vector<19x16xf32> to vector<1x16xf32>
    %95 = vector.broadcast %89 : vector<8x1xf32> to vector<8x16xf32>
    %96 = vector.broadcast %94 : vector<1x16xf32> to vector<8x16xf32>
    %97 = arith.mulf %95, %96 : vector<8x16xf32>
    %98 = arith.addf %93, %97 : vector<8x16xf32>
    %99 = vector.extract_strided_slice %90 {offsets = [17, 0], sizes = [1, 16], strides = [1, 1]} : vector<19x16xf32> to vector<1x16xf32>
    %100 = vector.broadcast %39 : vector<8x1xf32> to vector<8x16xf32>
    %101 = vector.broadcast %99 : vector<1x16xf32> to vector<8x16xf32>
    %102 = arith.mulf %100, %101 : vector<8x16xf32>
    %103 = arith.addf %98, %102 : vector<8x16xf32>
    %104 = vector.extract_strided_slice %90 {offsets = [18, 0], sizes = [1, 16], strides = [1, 1]} : vector<19x16xf32> to vector<1x16xf32>
    %105 = vector.broadcast %40 : vector<8x1xf32> to vector<8x16xf32>
    %106 = vector.broadcast %104 : vector<1x16xf32> to vector<8x16xf32>
    %107 = arith.mulf %105, %106 : vector<8x16xf32>
    %108 = arith.addf %103, %107 : vector<8x16xf32>
    %109 = vector.broadcast %91 : vector<1x16xf32> to vector<8x16xf32>
    %110 = arith.addf %108, %109 : vector<8x16xf32>
    %cst_43 = arith.constant 0.000000e+00 : f32
    %111 = vector.broadcast %cst_43 : f32 to vector<8x16xf32>
    %112 = arith.maximumf %110, %111 : vector<8x16xf32>
    %c424 = arith.constant 424 : index
    %c0_44 = arith.constant 0 : index
    %113 = vector.load %arg2[%c424, %c0_44] : memref<504x128xf32, #tpu.memory_space<vmem>>, vector<1x16xf32>
    %114 = vector.broadcast %113 : vector<1x16xf32> to vector<8x16xf32>
    %115 = arith.mulf %112, %114 : vector<8x16xf32>
    %cst_45 = arith.constant dense<0.000000e+00> : vector<8xf32>
    %116 = vector.multi_reduction <add>, %115, %cst_45 [1] : vector<8x16xf32> to vector<8xf32>
    %117 = vector.shape_cast %116 : vector<8xf32> to vector<8x1xf32>
    %c425 = arith.constant 425 : index
    %c0_46 = arith.constant 0 : index
    %118 = vector.load %arg2[%c425, %c0_46] : memref<504x128xf32, #tpu.memory_space<vmem>>, vector<1x1xf32>
    %119 = vector.broadcast %118 : vector<1x1xf32> to vector<8x1xf32>
    %120 = arith.addf %117, %119 : vector<8x1xf32>
    %121 = arith.addf %89, %120 : vector<8x1xf32>
    %c432 = arith.constant 432 : index
    %c0_47 = arith.constant 0 : index
    %122 = vector.load %arg2[%c432, %c0_47] : memref<504x128xf32, #tpu.memory_space<vmem>>, vector<19x16xf32>
    %c451 = arith.constant 451 : index
    %c0_48 = arith.constant 0 : index
    %123 = vector.load %arg2[%c451, %c0_48] : memref<504x128xf32, #tpu.memory_space<vmem>>, vector<1x16xf32>
    %124 = vector.extract_strided_slice %122 {offsets = [0, 0], sizes = [16, 16], strides = [1, 1]} : vector<19x16xf32> to vector<16x16xf32>
    %cst_49 = arith.constant dense<0.000000e+00> : vector<8x16xf32>
    %125 = tpu.matmul %23, %124, %cst_49 {dimension_numbers = #tpu.dot_dimension_numbers<[1], [0], [0], [1], [0, 0, 1, 1], [], []>} : vector<8x16xf32>, vector<16x16xf32>, vector<8x16xf32> -> vector<8x16xf32>
    %126 = vector.extract_strided_slice %122 {offsets = [16, 0], sizes = [1, 16], strides = [1, 1]} : vector<19x16xf32> to vector<1x16xf32>
    %127 = vector.broadcast %121 : vector<8x1xf32> to vector<8x16xf32>
    %128 = vector.broadcast %126 : vector<1x16xf32> to vector<8x16xf32>
    %129 = arith.mulf %127, %128 : vector<8x16xf32>
    %130 = arith.addf %125, %129 : vector<8x16xf32>
    %131 = vector.extract_strided_slice %122 {offsets = [17, 0], sizes = [1, 16], strides = [1, 1]} : vector<19x16xf32> to vector<1x16xf32>
    %132 = vector.broadcast %39 : vector<8x1xf32> to vector<8x16xf32>
    %133 = vector.broadcast %131 : vector<1x16xf32> to vector<8x16xf32>
    %134 = arith.mulf %132, %133 : vector<8x16xf32>
    %135 = arith.addf %130, %134 : vector<8x16xf32>
    %136 = vector.extract_strided_slice %122 {offsets = [18, 0], sizes = [1, 16], strides = [1, 1]} : vector<19x16xf32> to vector<1x16xf32>
    %137 = vector.broadcast %40 : vector<8x1xf32> to vector<8x16xf32>
    %138 = vector.broadcast %136 : vector<1x16xf32> to vector<8x16xf32>
    %139 = arith.mulf %137, %138 : vector<8x16xf32>
    %140 = arith.addf %135, %139 : vector<8x16xf32>
    %141 = vector.broadcast %123 : vector<1x16xf32> to vector<8x16xf32>
    %142 = arith.addf %140, %141 : vector<8x16xf32>
    %cst_50 = arith.constant 0.000000e+00 : f32
    %143 = vector.broadcast %cst_50 : f32 to vector<8x16xf32>
    %144 = arith.maximumf %142, %143 : vector<8x16xf32>
    %c456 = arith.constant 456 : index
    %c0_51 = arith.constant 0 : index
    %145 = vector.load %arg2[%c456, %c0_51] : memref<504x128xf32, #tpu.memory_space<vmem>>, vector<1x16xf32>
    %146 = vector.broadcast %145 : vector<1x16xf32> to vector<8x16xf32>
    %147 = arith.mulf %144, %146 : vector<8x16xf32>
    %cst_52 = arith.constant dense<0.000000e+00> : vector<8xf32>
    %148 = vector.multi_reduction <add>, %147, %cst_52 [1] : vector<8x16xf32> to vector<8xf32>
    %149 = vector.shape_cast %148 : vector<8xf32> to vector<8x1xf32>
    %c457 = arith.constant 457 : index
    %c0_53 = arith.constant 0 : index
    %150 = vector.load %arg2[%c457, %c0_53] : memref<504x128xf32, #tpu.memory_space<vmem>>, vector<1x1xf32>
    %151 = vector.broadcast %150 : vector<1x1xf32> to vector<8x1xf32>
    %152 = arith.addf %149, %151 : vector<8x1xf32>
    %153 = arith.addf %89, %152 : vector<8x1xf32>
    %154 = arith.subf %39, %153 : vector<8x1xf32>
    %cst_54 = arith.constant 0.000000e+00 : f32
    %155 = vector.broadcast %cst_54 : f32 to vector<8x1xf32>
    %156 = arith.maximumf %154, %155 : vector<8x1xf32>
    %157 = arith.subf %153, %40 : vector<8x1xf32>
    %cst_55 = arith.constant 0.000000e+00 : f32
    %158 = vector.broadcast %cst_55 : f32 to vector<8x1xf32>
    %159 = arith.maximumf %157, %158 : vector<8x1xf32>
    %160 = arith.addf %156, %159 : vector<8x1xf32>
    %cst_56 = arith.constant 1.000000e-01 : f32
    %161 = vector.broadcast %cst_56 : f32 to vector<8x1xf32>
    %162 = arith.mulf %161, %160 : vector<8x1xf32>
    %163 = arith.subf %153, %162 : vector<8x1xf32>
    %cst_57 = arith.constant 1.000000e-01 : f32
    %164 = vector.broadcast %cst_57 : f32 to vector<8x1xf32>
    %165 = arith.mulf %164, %156 : vector<8x1xf32>
    %166 = arith.subf %39, %165 : vector<8x1xf32>
    %cst_58 = arith.constant 1.000000e-01 : f32
    %167 = vector.broadcast %cst_58 : f32 to vector<8x1xf32>
    %168 = arith.mulf %167, %159 : vector<8x1xf32>
    %169 = arith.addf %40, %168 : vector<8x1xf32>
    %c464 = arith.constant 464 : index
    %c0_59 = arith.constant 0 : index
    %170 = vector.load %arg2[%c464, %c0_59] : memref<504x128xf32, #tpu.memory_space<vmem>>, vector<16x8xf32>
    %cst_60 = arith.constant dense<0.000000e+00> : vector<8x8xf32>
    %171 = tpu.matmul %23, %170, %cst_60 {dimension_numbers = #tpu.dot_dimension_numbers<[1], [0], [0], [1], [0, 0, 1, 1], [], []>} : vector<8x16xf32>, vector<16x8xf32>, vector<8x8xf32> -> vector<8x8xf32>
    %c480 = arith.constant 480 : index
    %c0_61 = arith.constant 0 : index
    %172 = vector.load %arg2[%c480, %c0_61] : memref<504x128xf32, #tpu.memory_space<vmem>>, vector<1x8xf32>
    %173 = vector.broadcast %172 : vector<1x8xf32> to vector<8x8xf32>
    %174 = arith.addf %171, %173 : vector<8x8xf32>
    %cst_62 = arith.constant 0.000000e+00 : f32
    %175 = vector.broadcast %cst_62 : f32 to vector<8x8xf32>
    %176 = arith.maximumf %174, %175 : vector<8x8xf32>
    %c488 = arith.constant 488 : index
    %c0_63 = arith.constant 0 : index
    %177 = vector.load %arg2[%c488, %c0_63] : memref<504x128xf32, #tpu.memory_space<vmem>>, vector<8x3xf32>
    %cst_64 = arith.constant dense<0.000000e+00> : vector<8x3xf32>
    %178 = tpu.matmul %176, %177, %cst_64 {dimension_numbers = #tpu.dot_dimension_numbers<[1], [0], [0], [1], [0, 0, 1, 1], [], []>} : vector<8x8xf32>, vector<8x3xf32>, vector<8x3xf32> -> vector<8x3xf32>
    %c496 = arith.constant 496 : index
    %c0_65 = arith.constant 0 : index
    %179 = vector.load %arg2[%c496, %c0_65] : memref<504x128xf32, #tpu.memory_space<vmem>>, vector<1x3xf32>
    %180 = vector.broadcast %179 : vector<1x3xf32> to vector<8x3xf32>
    %181 = arith.addf %178, %180 : vector<8x3xf32>
    %182 = arith.negf %181 : vector<8x3xf32>
    %183 = math.exp %182 : vector<8x3xf32>
    %cst_66 = arith.constant 1.000000e+00 : f32
    %184 = vector.broadcast %cst_66 : f32 to vector<8x3xf32>
    %185 = arith.addf %184, %183 : vector<8x3xf32>
    %186 = arith.divf %184, %185 : vector<8x3xf32>
    %187 = arith.addf %156, %159 : vector<8x1xf32>
    %188 = tpu.concatenate %163, %166, %169, %39, %40, %89, %121, %153, %187 in 1 : vector<8x1xf32>, vector<8x1xf32>, vector<8x1xf32>, vector<8x1xf32>, vector<8x1xf32>, vector<8x1xf32>, vector<8x1xf32>, vector<8x1xf32>, vector<8x1xf32> -> vector<8x9xf32>
    %cst_67 = arith.constant 0.000000e+00 : f32
    %189 = vector.broadcast %cst_67 : f32 to vector<8x84xf32>
    %190 = tpu.concatenate %60, %188, %186, %189 in 1 : vector<8x32xf32>, vector<8x9xf32>, vector<8x3xf32>, vector<8x84xf32> -> vector<8x128xf32>
    %c0_68 = arith.constant 0 : index
    %c0_69 = arith.constant 0 : index
    %191 = vector.load %arg3[%c0_68, %c0_69] : memref<8x128xf32, #tpu.memory_space<vmem>>, vector<8x128xf32>
    tpu.vector_store %arg3[%c0_68, %c0_69], %190 {strides = array<i32>} : memref<8x128xf32, #tpu.memory_space<vmem>>, vector<8x128xf32>,
    return
  }
  func.func @transform_0(%arg0: i32) -> (i32, i32) {
    %c0_i32 = arith.constant 0 : i32
    %c0_i32_0 = arith.constant 0 : i32
    return %arg0, %c0_i32 : i32, i32
  }
  func.func @transform_1(%arg0: i32) -> (i32, i32) {
    %c0_i32 = arith.constant 0 : i32
    %c0_i32_0 = arith.constant 0 : i32
    %c0_i32_1 = arith.constant 0 : i32
    return %c0_i32, %c0_i32_0 : i32, i32
  }
  func.func @transform_2(%arg0: i32) -> (i32, i32) {
    %c0_i32 = arith.constant 0 : i32
    %c0_i32_0 = arith.constant 0 : i32
    return %arg0, %c0_i32 : i32, i32
  }
}

</mosaic_0001>

<bundles_post_ra>
// kernel: tpu_custom_call.1
= control target key start
LH: loop header
LB: loop body
LE: loop exit
PB: predicated region body
PF: predicated region fallthrough
CT: control target
= control target key end

     0   :  { %7 = vsyncpa [#allocation3], 0  ;;  %s1989_s0 = inlined_call_operand.hbm [shape: f32[8,16], index: 0, kind: input, shape index: {}]   ;;  %s1990_s1 = inlined_call_operand.hbm [shape: f32[504,128], index: 1, kind: input, shape index: {}]   ;;  %s1991_s2 = inlined_call_operand.hbm [shape: f32[8,128], index: 2, kind: output, shape index: {}]  }
   0x1   :  { %8 = vsyncpa [#allocation6], 0 }
   0x2   :  { %9 = vsyncpa [#allocation4], 0  ;;  %s1792_s9 = smov [#allocation2]   ;;  %s1793_s11 = smov [#allocation5]  }
   0x3   :  { %s16_s10 = sshll.u32 %s1792_s9, 4  ;;  %s25_s12 = sshll.u32 %s1793_s11, 4  ;;  %s17_s10 = int_to_ptr.vmem [resolvable:$true] %s16_s10  ;;  %s26_s12 = int_to_ptr.vmem [resolvable:$true] %s25_s12 }
   0x4   :  { %s1734_s13 = scalar_lea.vmem %s17_s10, 128  ;;  %p1739_p1 = scmp.lt.s32.totalorder %s17_s10, %s17_s10 }
   0x5   :  { %p1735_p0 = scmp.ne.s32.totalorder %s17_s10, %s1734_s13  ;;  %p1740_p2 = scmp.lt.s32.totalorder %s1734_s13, %s1734_s13 }
   0x7   :  { %p1741_p3 = por %p1740_p2, %p1739_p1 }
   0x9   :  { %p1742_p4 = pnand %p1741_p3, %p1735_p0 }
   0xb   :  { %1745 = shalt.err (!%p1742_p4)
}
   0xc   :  { %19 = dma.hbm_to_vmem [thread:$0]  %s1989_s0, 128, %s17_s10, [#allocation3]  }
   0xd   :  { %s1754_s16 = scalar_lea.vmem %s26_s12, 8064  ;;  %p1759_p6 = scmp.lt.s32.totalorder %s26_s12, %s26_s12 }
   0xe   :  { %p1755_p5 = scmp.ne.s32.totalorder %s26_s12, %s1754_s16  ;;  %p1760_p7 = scmp.lt.s32.totalorder %s1754_s16, %s1754_s16 }
  0x10   :  { %p1761_p8 = por %p1760_p7, %p1759_p6 }
  0x12   :  { %p1762_p9 = pnand %p1761_p8, %p1755_p5 }
  0x14   :  { %1765 = shalt.err (!%p1762_p9)
}
  0x15   :  { %s1794_s17 = smov 128   ;;  %s1795_s18 = smov 8  }
  0x16   :  { %31 = dma.hbm_to_vmem [thread:$0]  %s1990_s1, 8064, %s26_s12, [#allocation6], %s1794_s17, %s1794_s17, %s1795_s18  }
  0x17   :  { %1786 = dma.done.wait [#allocation3], 128  }
  0x18   :  { %1787 = vsyncadd [#allocation3], 4294967168 }
  0x19   :  { %1788 = dma.done.wait [#allocation6], 8064  }
  0x1a   :  { %1789 = vsyncadd [#allocation6], 4294959232  ;;  %v1796_v0 = vmov 0.0   ;;  %vm1797_vm0 = vmmov 0   ;;  %v40_v1 = vld [vmem:[#allocation5 + $0x8] sm:$0xff]  ;;  %v39_v2 = vld [vmem:[#allocation5] sm:$0xff] }
  0x1b   :  { %1560 = vmatprep.subr.mxu0 %v1796_v0  ;;  %1564 = vmatprep.mubr.msk.f32.mxu0 %vm1797_vm0, %v1796_v0  ;;  %v38_v3 = vld [vmem:[#allocation2] sm:$0xff]  ;;  %vm46_vm1 = vcmask 130048   ;;  %v132_v4 = vld [vmem:[#allocation5 + $0x70] sm:$0xff]  ;;  %v131_v5 = vld [vmem:[#allocation5 + $0x68] sm:$0xff]  ;;  %vm138_vm2 = vcmask 785408   ;;  %s1798_s0 = smov 80  }
  0x1c   :  { %1567 = vmatprep.subr.mxu1 %v1796_v0  ;;  %1591 = vmatprep.mubr.msk.f32.mxu1 %vm1797_vm0, %v1796_v0  ;;  %v130_v6 = vld [vmem:[#allocation5 + $0x60] sm:$0xff]  ;;  %v129_v7 = vld [vmem:[#allocation5 + $0x58] sm:$0xff]  ;;  %v128_v8 = vld [vmem:[#allocation5 + $0x50] sm:$0xff]  ;;  %s1799_s1 = smov 112   ;;  %vm225_vm3 = vcmask 261120   ;;  %v1800_v54 = vmov 0  }
  0x1d   :  { %1561 = vmatpush3.msra.mxu0 %v40_v1  ;;  %1568 = vmatpush3.msra.mxu1 %v132_v4  ;;  %v127_v9 = vld [vmem:[#allocation5 + $0x48] sm:$0xff]  ;;  %v126_v10 = vld [vmem:[#allocation5 + $0x40] sm:$0xff]  ;;  %v125_v11 = vld [vmem:[#allocation5 + $0x38] sm:$0xff]  ;;  %v1801_v61 = vmov 1   ;;  %vm1313_vm4 = vcmask 64512   ;;  %s1802_s21 = smov 5  }
  0x1e   :  { %1562 = vmatprep.subr.mxu0 %v1796_v0  ;;  %1569 = vmatprep.subr.mxu1 %v1796_v0  ;;  %v124_v12 = vld [vmem:[#allocation5 + $0x30] sm:$0xff]  ;;  %v123_v13 = vld [vmem:[#allocation5 + $0x28] sm:$0xff]  ;;  %v122_v14 = vld [vmem:[#allocation5 + $0x20] sm:$0xff]  ;;  %s1803_s22 = smov 127   ;;  %s1804_s23 = smov 7   ;;  %vm1418_vm5 = vcmask 7168  }
  0x1f   :  { %1563 = vmatpush3.msra.mxu0 %v39_v2  ;;  %1570 = vmatpush3.msra.mxu1 %v131_v5  ;;  %v121_v15 = vld [vmem:[#allocation5 + $0x18] sm:$0xff]  ;;  %v1463_v16 = vld [vmem:[#allocation5 + $0x10] ss:$0 sm:$0xff]  ;;  %v214_v23 = vld [vmem:[#allocation5 + $0x88] sm:$0xff]  ;;  %s1805_s24 = smov 1   ;;  %s1806_s25 = smov 3  }
  0x20   :  { %1565 = vmatmul.mubr.msk.f32.vlgmr.msra.gmra.mxu0 %vm46_vm1, %v38_v3  ;;  %1571 = vmatprep.subr.mxu1 %v1796_v0  ;;  %v216_v21 = vld [vmem:[#allocation5 + $0x98] sm:$0xff]  ;;  %v215_v22 = vld [vmem:[#allocation5 + $0x90] sm:$0xff]  ;;  %v213_v24 = vld [vmem:[#allocation5 + $0x80] sm:$0xff]  ;;  %v545_v3 = vlaneseq  ;;  %s1807_s26 = smov 6   ;;  %s1808_s27 = smov 41   ;;  %vm1420_vm6 = vcmask 15360  }
  0x21   :  { %1594 = vmatprep.subr.mxu0 %v1796_v0  ;;  %1572 = vmatpush3.msra.mxu1 %v130_v6  ;;  %v1465_v25 = vld [vmem:[#allocation5 + $0x78] ss:$0 sm:$0xff]  ;;  %v303_v30 = vld [vmem:[#allocation5 + $0xd0] sm:$0xff]  ;;  %v302_v32 = vld [vmem:[#allocation5 + $0xc8] sm:$0xff]  ;;  %vm1422_vm7 = vcmask 23552   ;;  %vm1424_vm8 = vcmask 31744  }
  0x22   :  { %1602 = vmatprep.mubr.msk.f32.mxu0 %vm1797_vm0, %v1796_v0  ;;  %1573 = vmatprep.subr.mxu1 %v1796_v0  ;;  %v1467_v33 = vld [vmem:[#allocation5 + $0xa0] ss:$0 sm:$0xff]  ;;  %v300_v38 = vld [vmem:[#allocation5 + $0xb8] sm:$0xff]  ;;  %v299_v39 = vld [vmem:[#allocation5 + $0xb0] sm:$0xff]  ;;  %v1905_v4 = vshrl.u32 %v545_v3, 7  ;;  %vm1426_vm9 = vcmask 39936  }
  0x23   :  { %1574 = vmatpush3.msra.mxu1 %v129_v7  ;;  %1595 = vmatpush3.msra.mxu0 %v216_v21  ;;  %v301_v36 = vld [vmem:[#allocation5 + $0xc0] sm:$0xff]  ;;  %v298_v40 = vld [vmem:[#allocation5 + $0xa8] sm:$0xff]  ;;  %v1469_v46 = vld [vmem:[#allocation5 + $0xd8] ss:$0 sm:$0xff]  ;;  %vm1428_vm10 = vcmask 48128   ;;  %vm1430_vm11 = vcmask 56320  }
  0x24   :  { %1575 = vmatprep.subr.mxu1 %v1796_v0  ;;  %1596 = vmatprep.subr.mxu0 %v1796_v0  ;;  %v459_v42 = vld [vmem:[#allocation5 + $0xe8] sm:$0xff]  ;;  %v458_v43 = vld [vmem:[#allocation5 + $0xe0] sm:$0xff]  ;;  %v649_v52 = vld [vmem:[#allocation5 + $0x130] sm:$0xff]  ;;  %v1908_v5 = vsub.s32 0, %v1905_v4  ;;  %v1911_v7 = vsub.s32 1, %v1905_v4  ;;  %s1809_s28 = smov 32  }
  0x25   :  { %1576 = vmatpush3.msra.mxu1 %v128_v8  ;;  %1597 = vmatpush3.msra.mxu0 %v215_v22  ;;  %v648_v53 = vld [vmem:[#allocation5 + $0x128] sm:$0xff]  ;;  %v1472_v55 = vld [vmem:[#allocation5 + $0xf0] ss:$0 sm:$0xff]  ;;  %v566_v63 = vld [vmem:[#allocation5 + $0x100] sm:$0xff]  ;;  %vm1442_vm12 = vcmask 334848   ;;  %s1810_s29 = smov [#allocation7]  }
  0x26   :  { %1577 = vmatprep.subr.mxu1 %v1796_v0  ;;  %1598 = vmatprep.subr.mxu0 %v1796_v0  ;;  %v567_v62 = vld [vmem:[#allocation5 + $0x108] sm:$0xff]  ;;  %v653_v1 = vld [vmem:[#allocation5 + $0x150] sm:$0xff]  ;;  %v538_v6 = vld [vmem:[#allocation5 + $0xf8] sm:$0x3]  ;;  %s1453_s30 = sshll.u32 %s1810_s29, 4  ;;  %vm1444_vm13 = vcmask 359424   ;;  %s1454_s30 = int_to_ptr.vmem [resolvable:$true] %s1453_s30 }
  0x27   :  { %1578 = vmatpush3.msra.mxu1 %v127_v9  ;;  %1599 = vmatpush3.msra.mxu0 %v214_v23  ;;  %v652_v2 = vld [vmem:[#allocation5 + $0x148] sm:$0xff]  ;;  %v548_v9 = vrot.slane %v538_v6, %v1908_v5  ;;  %v650_v21 = vld [vmem:[#allocation5 + $0x138] sm:$0xff]  ;;  %v1475_v22 = vld [vmem:[#allocation5 + $0x110] ss:$0 sm:$0xff]  ;;  %s1766_s3 = scalar_lea.vmem %s1454_s30, 128  ;;  %p1771_p11 = scmp.lt.s32.totalorder %s1454_s30, %s1454_s30 }
  0x28   :  { %1579 = vmatprep.subr.mxu1 %v1796_v0  ;;  %1600 = vmatprep.subr.mxu0 %v1796_v0  ;;  %p1767_p10 = scmp.ne.s32.totalorder %s1454_s30, %s1766_s3  ;;  %p1772_p12 = scmp.lt.s32.totalorder %s1766_s3, %s1766_s3 }
  0x29   :  { %1580 = vmatpush3.msra.mxu1 %v126_v10  ;;  %1601 = vmatpush3.msra.mxu0 %v213_v24  ;;  %v557_v10 = vrot.slane %v538_v6, %v1911_v7 }
  0x2a   :  { %1581 = vmatprep.subr.mxu1 %v1796_v0  ;;  %1605 = vmatprep.subr.mxu0 %v1796_v0  ;;  %p1773_p13 = por %p1772_p12, %p1771_p11 }
  0x2b   :  { %1582 = vmatpush3.msra.mxu1 %v125_v11  ;;  %1718 = vset.pattern.permute.xlu1 %v1800_v54 }
  0x2c   :  { %1583 = vmatprep.subr.mxu1 %v1796_v0  ;;  %1721 = vset.pattern.permute.xlu0 %v1800_v54  ;;  %p1774_p0 = pnand %p1773_p13, %p1767_p10 }
  0x2d   :  { %1584 = vmatpush3.msra.mxu1 %v124_v12 }
  0x2e   :  { %1585 = vmatprep.subr.mxu1 %v1796_v0 }
  0x2f   :  { %1586 = vmatpush3.msra.mxu1 %v123_v13 }
  0x30   :  { %1587 = vmatprep.subr.mxu1 %v1796_v0 }
  0x31   :  { %1588 = vmatpush3.msra.mxu1 %v122_v14  ;;  %v1474_v14 = vld [vmem:[#allocation5 + $0xfa] ss:$0 sm:$0xff] }
  0x32   :  { %1589 = vmatprep.subr.mxu1 %v1796_v0 }
  0x33   :  { %1590 = vmatpush3.msra.mxu1 %v121_v15 }
  0x34   :  { %1630 = vmatprep.subr.mxu1 %v1796_v0 }
  0xe0   :  { %v116_v17 = vpop.f32.mrf.mxu0 }
  0xe1   :  { %v117_v18 = vadd.f32 %v1463_v16, %v116_v17 }
  0xe2   :  { %v1566_v19 = vpop.f32.mrf.mxu0 }
  0xe3   :  { %v120_v20 = vmax.f32 %v117_v18, 0.0  ;;  %v647_v18 = vld [vmem:[#allocation5 + $0x120] sm:$0xff]  ;;  %v646_v19 = vld [vmem:[#allocation5 + $0x118] sm:$0xff] }
  0xe5   :  { %1592 = vmatmul.mubr.msk.f32.vlgmr.msra.gmra.mxu1 %vm138_vm2, %v120_v20  ;;  %v651_v20 = vld [vmem:[#allocation5 + $0x140] sm:$0xff] }
  0xe6   :  { %1634 = vmatprep.mubr.msk.f32.mxu1 %vm1797_vm0, %v1796_v0  ;;  %1631 = vmatpush3.msra.mxu1 %v567_v62 }
  0xe7   :  { %1632 = vmatprep.subr.mxu1 %v1796_v0 }
  0xe8   :  { %1633 = vmatpush3.msra.mxu1 %v566_v63 }
  0xe9   :  { %1644 = vmatprep.subr.mxu1 %v1796_v0 }
 0x1a5   :  { %v208_v26 = vpop.f32.mrf.mxu1 }
 0x1a6   :  { %v1862_v27 = vadd.f32 %v1465_v25, %v208_v26  ;;  %v976_v25 = vld [vmem:[#allocation5 + $0x198] sm:$0xff] }
 0x1a7   :  { %v1593_v28 = vpop.f32.mrf.mxu1 }
 0x1a8   :  { %v212_v29 = vmax.f32 %v1862_v27, 0.0 }
 0x1aa   :  { %223 = vrot.lane.b32.xlu0 %v212_v29, %s1798_s0  ;;  %v1230_v29 = vld [vmem:[#allocation5 + $0x1d8] sm:$0xff] }
 0x1ae   :  { %383 = vrot.lane.b32.xlu0 %v1862_v27, %s1799_s1 }
 0x21c   :  { %v224_v31 = vpop.permute.xlu0 %223 }
 0x21d   :  { %1603 = vmatmul.mubr.msk.f32.vlgmr.msra.gmra.mxu0 %vm225_vm3, %v224_v31  ;;  %v1229_v31 = vld [vmem:[#allocation5 + $0x1d0] sm:$0xff] }
 0x21e   :  { %1606 = vmatpush3.msra.mxu0 %v303_v30  ;;  %1609 = vmatprep.mubr.msk.f32.mxu0 %vm1797_vm0, %v1796_v0 }
 0x21f   :  { %1607 = vmatprep.subr.mxu0 %v1796_v0 }
 0x220   :  { %1608 = vmatpush3.msra.mxu0 %v302_v32  ;;  %v384_v41 = vpop.permute.xlu0 %383  ;;  %v880_v32 = vld [vmem:[#allocation5 + $0x178] sm:$0xff] }
 0x221   :  { %1612 = vmatprep.subr.mxu0 %v1796_v0 }
 0x2dd   :  { %v294_v34 = vpop.f32.mrf.mxu0 }
 0x2de   :  { %v1871_v35 = vadd.f32 %v1467_v33, %v294_v34  ;;  %v879_v33 = vld [vmem:[#allocation5 + $0x170] sm:$0xff]  ;;  %v878_v34 = vld [vmem:[#allocation5 + $0x168] sm:$0xff] }
 0x2df   :  { %v1604_v37 = vpop.f32.mrf.mxu0 }
 0x2e0   :  { %1610 = vmatmul.mubr.msk.f32.vlgmr.msra.gmra.mxu0 %vm46_vm1, %v1871_v35 }
 0x2e1   :  { %1613 = vmatpush3.msra.mxu0 %v301_v36  ;;  %1620 = vmatprep.mubr.msk.f32.mxu0 %vm1797_vm0, %v1796_v0  ;;  %v877_v36 = vld [vmem:[#allocation5 + $0x160] sm:$0xff] }
 0x2e2   :  { %1614 = vmatprep.subr.mxu0 %v1796_v0 }
 0x2e3   :  { %1615 = vmatpush3.msra.mxu0 %v300_v38  ;;  %v1480_v38 = vld [vmem:[#allocation5 + $0x158] ss:$0 sm:$0xff] }
 0x2e4   :  { %1616 = vmatprep.subr.mxu0 %v1796_v0 }
 0x2e5   :  { %1617 = vmatpush3.msra.mxu0 %v299_v39 }
 0x2e6   :  { %1618 = vmatprep.subr.mxu0 %v1796_v0 }
 0x2e7   :  { %1619 = vmatpush3.msra.mxu0 %v298_v40 }
 0x2e8   :  { %1621 = vmatmul.mubr.msk.f32.vlgmr.msra.gmra.mxu0 %vm225_vm3, %v384_v41  ;;  %1623 = vmatprep.subr.mxu0 %v1796_v0 }
 0x2e9   :  { %1627 = vmatprep.mubr.msk.f32.mxu0 %vm1797_vm0, %v1796_v0  ;;  %1624 = vmatpush3.msra.mxu0 %v459_v42 }
 0x2ea   :  { %1625 = vmatprep.subr.mxu0 %v1796_v0 }
 0x2eb   :  { %1626 = vmatpush3.msra.mxu0 %v458_v43 }
 0x2ec   :  { %1637 = vmatprep.subr.mxu0 %v1796_v0 }
 0x3a0   :  { %v378_v44 = vpop.f32.mrf.mxu0 }
 0x3a1   :  { %v379_v47 = vadd.f32 %v1469_v46, %v378_v44 }
 0x3a2   :  { %v1611_v45 = vpop.f32.mrf.mxu0 }
 0x3a3   :  { %v1094_v45 = vld [vmem:[#allocation5 + $0x1b8] sm:$0xff] }
 0x3a8   :  { %v453_v48 = vpop.f32.mrf.mxu0 }
 0x3a9   :  { %v454_v49 = vadd.f32 %v453_v48, %v379_v47  ;;  %v1493_v47 = vld [vmem:[#allocation5 + $0x1e0] ss:$0 sm:$0xff]  ;;  %v1093_v48 = vld [vmem:[#allocation5 + $0x1b0] sm:$0xff] }
 0x3aa   :  { %v1622_v50 = vpop.f32.mrf.mxu0 }
 0x3ab   :  { %v457_v51 = vmax.f32 %v454_v49, 0.0 }
 0x3ad   :  { %1628 = vmatmul.mubr.msk.f32.vlgmr.msra.gmra.mxu0 %vm46_vm1, %v457_v51  ;;  %v1307_v51 = vld [vmem:[#allocation5 + $0x1e8] sm:$0xff] }
 0x3ae   :  { %1638 = vmatpush3.msra.mxu0 %v649_v52  ;;  %1641 = vmatprep.mubr.msk.f32.mxu0 %vm1797_vm0, %v1796_v0 }
 0x3af   :  { %1639 = vmatprep.subr.mxu0 %v1796_v0 }
 0x3b0   :  { %1640 = vmatpush3.msra.mxu0 %v648_v53 }
 0x3b1   :  { %1642 = vmatmul.mubr.msk.f32.vlgmr.msra.gmra.mxu0 %vm46_vm1, %v1871_v35  ;;  %1651 = vmatprep.subr.mxu0 %v1796_v0 }
 0x3b2   :  { %1659 = vmatprep.mubr.msk.f32.mxu0 %vm1797_vm0, %v1796_v0  ;;  %1652 = vmatpush3.msra.mxu0 %v653_v1 }
 0x3b3   :  { %1653 = vmatprep.subr.mxu0 %v1796_v0 }
 0x3b4   :  { %1654 = vmatpush3.msra.mxu0 %v652_v2 }
 0x3b5   :  { %1655 = vmatprep.subr.mxu0 %v1796_v0 }
 0x3b6   :  { %1656 = vmatpush3.msra.mxu0 %v651_v20 }
 0x3b7   :  { %1657 = vmatprep.subr.mxu0 %v1796_v0 }
 0x3b8   :  { %1658 = vmatpush3.msra.mxu0 %v650_v21  ;;  %v1486_v21 = vld [vmem:[#allocation5 + $0x1a3] ss:$0 sm:$0xff] }
 0x3b9   :  { %1673 = vmatprep.subr.mxu0 %v1796_v0 }
 0x46d   :  { %v534_v56 = vpop.f32.mrf.mxu0 }
 0x46e   :  { %v1895_v57 = vadd.f32 %v1472_v55, %v534_v56 }
 0x46f   :  { %v1629_v58 = vpop.f32.mrf.mxu0 }
 0x470   :  { %542 = vperm.xlu1 %1718, %v1895_v57  }
 0x471   :  { %v1898_v59 = vpop.f32.mrf.mxu0 }
 0x473   :  { %v1643_v60 = vpop.f32.mrf.mxu0 }
 0x474   :  { %1719 = vset.pattern.permute.xlu1 %v1801_v61 }
 0x475   :  { %551 = vperm.xlu1 %1719, %v1895_v57  }
 0x479   :  { %1720 = vset.pattern.permute.xlu1 %v1800_v54  ;;  %v1481_v54 = vld [vmem:[#allocation5 + $0x180] ss:$0 sm:$0xff] }
 0x4eb   :  { %v1913_v8 = vpop.permute.xlu1 %542 }
 0x4ec   :  { %v549_v12 = vmul.f32 %v548_v9, %v1913_v8  ;;  %v977_v9 = vld [vmem:[#allocation5 + $0x1a0] sm:$0x7] }
 0x4f0   :  { %v1917_v11 = vpop.permute.xlu1 %551 }
 0x4f1   :  { %v558_v13 = vmul.f32 %v557_v10, %v1917_v11  ;;  %v1067_v10 = vsub.s32 2, %v1905_v4 }
 0x4f3   :  { %v559_v15 = vadd.f32 %v558_v13, %v549_v12  ;;  %v987_v12 = vrot.slane %v977_v9, %v1908_v5  ;;  %v1062_v13 = vrot.slane %v977_v9, %v1911_v7 }
 0x4f5   :  { %v564_v16 = vadd.f32 %v1474_v14, %v559_v15  ;;  %v1068_v15 = vrot.slane %v977_v9, %v1067_v10 }
 0x4f7   :  { %v565_v17 = vmax.f32 %v564_v16, 0.0 }
 0x4f9   :  { %1635 = vmatmul.mubr.msk.f32.vlgmr.msra.gmra.mxu1 %vm46_vm1, %v565_v17  ;;  %v1063_v17 = vmul.f32 %v1062_v13, %v1913_v8 }
 0x4fa   :  { %1645 = vmatpush3.msra.mxu1 %v647_v18  ;;  %1648 = vmatprep.mubr.msk.f32.mxu1 %vm1797_vm0, %v1796_v0 }
 0x4fb   :  { %1646 = vmatprep.subr.mxu1 %v1796_v0 }
 0x4fc   :  { %1647 = vmatpush3.msra.mxu1 %v646_v19  ;;  %v1069_v19 = vmul.f32 %v1068_v15, %v1917_v11 }
 0x4fd   :  { %1649 = vmatmul.mubr.msk.f32.vlgmr.msra.gmra.mxu1 %vm46_vm1, %v1862_v27  ;;  %1662 = vmatprep.subr.mxu1 %v1796_v0  ;;  %v975_v27 = vld [vmem:[#allocation5 + $0x190] sm:$0xff] }
 0x4fe   :  { %1670 = vmatprep.mubr.msk.f32.mxu1 %vm1797_vm0, %v1796_v0  ;;  %1663 = vmatpush3.msra.mxu1 %v880_v32  ;;  %v1095_v32 = vld [vmem:[#allocation5 + $0x1c0] sm:$0x7] }
 0x4ff   :  { %1664 = vmatprep.subr.mxu1 %v1796_v0 }
 0x500   :  { %1665 = vmatpush3.msra.mxu1 %v879_v33  ;;  %v1105_v33 = vrot.slane %v1095_v32, %v1908_v5  ;;  %v1492_v5 = vld [vmem:[#allocation5 + $0x1c9] ss:$0 sm:$0xff] }
 0x501   :  { %1666 = vmatprep.subr.mxu1 %v1796_v0 }
 0x502   :  { %1667 = vmatpush3.msra.mxu1 %v878_v34  ;;  %v1180_v34 = vrot.slane %v1095_v32, %v1911_v7 }
 0x503   :  { %1668 = vmatprep.subr.mxu1 %v1796_v0 }
 0x504   :  { %1669 = vmatpush3.msra.mxu1 %v877_v36 }
 0x505   :  { %1680 = vmatprep.subr.mxu1 %v1796_v0 }
 0x5b9   :  { %v642_v23 = vpop.f32.mrf.mxu1 }
 0x5ba   :  { %v1932_v24 = vadd.f32 %v1475_v22, %v642_v23 }
 0x5bb   :  { %v1636_v26 = vpop.f32.mrf.mxu1 }
 0x5bc   :  { %1660 = vmatmul.mubr.msk.f32.vlgmr.msra.gmra.mxu0 %vm225_vm3, %v1932_v24 }
 0x5bd   :  { %v793_v28 = vpop.f32.mrf.mxu1  ;;  %1674 = vmatpush3.msra.mxu0 %v976_v25  ;;  %1677 = vmatprep.mubr.msk.f32.mxu0 %vm1797_vm0, %v1796_v0  ;;  %v1487_v25 = vld [vmem:[#allocation5 + $0x1a8] ss:$0 sm:$0xff] }
 0x5be   :  { %1675 = vmatprep.subr.mxu0 %v1796_v0  ;;  %v794_v37 = vadd.f32 %v793_v28, %v1898_v59  ;;  %v1483_v59 = vld [vmem:[#allocation5 + $0x188] ss:$0 sm:$0xff]  ;;  %v1488_v28 = vld [vmem:[#allocation5 + $0x1a9] ss:$0 sm:$0xff] }
 0x5bf   :  { %v1650_v30 = vpop.f32.mrf.mxu1  ;;  %1676 = vmatpush3.msra.mxu0 %v975_v27 }
 0x5c0   :  { %1678 = vmatmul.mubr.msk.f32.vlgmr.msra.gmra.mxu0 %vm46_vm1, %v1871_v35  ;;  %1687 = vmatprep.subr.mxu0 %v1796_v0 }
 0x5c1   :  { %1688 = vmatpush3.msra.mxu0 %v1230_v29  ;;  %1691 = vmatprep.mubr.msk.f32.mxu0 %vm1797_vm0, %v1796_v0 }
 0x5c2   :  { %1689 = vmatprep.subr.mxu0 %v1796_v0 }
 0x5c3   :  { %1690 = vmatpush3.msra.mxu0 %v1229_v31 }
 0x5c4   :  { %1692 = vmatmul.mubr.msk.f32.vlgmr.msra.gmra.mxu0 %vm46_vm1, %v1871_v35 }
 0x67c   :  { %v866_v39 = vpop.f32.mrf.mxu0 }
 0x67d   :  { %v870_v40 = vadd.f32 %v866_v39, %v794_v37  ;;  %v1186_v37 = vrot.slane %v1095_v32, %v1067_v10  ;;  %v1181_v39 = vmul.f32 %v1180_v34, %v1913_v8 }
 0x67e   :  { %v1661_v41 = vpop.f32.mrf.mxu0 }
 0x67f   :  { %v875_v42 = vadd.f32 %v1480_v38, %v870_v40  ;;  %v1187_v41 = vmul.f32 %v1186_v37, %v1917_v11 }
 0x680   :  { %v1055_v43 = vpop.f32.mrf.mxu0 }
 0x681   :  { %v876_v44 = vmax.f32 %v875_v42, 0.0 }
 0x682   :  { %v1679_v46 = vpop.f32.mrf.mxu0 }
 0x683   :  { %1671 = vmatmul.mubr.msk.f32.vlgmr.msra.gmra.mxu1 %vm225_vm3, %v876_v44  ;;  %v1491_v46 = vld [vmem:[#allocation5 + $0x1c8] ss:$0 sm:$0xff] }
 0x684   :  { %1681 = vmatpush3.msra.mxu1 %v1094_v45  ;;  %v1302_v49 = vpop.f32.mrf.mxu0  ;;  %1684 = vmatprep.mubr.msk.f32.mxu1 %vm1797_vm0, %v1796_v0 }
 0x685   :  { %v1303_v50 = vadd.f32 %v1493_v47, %v1302_v49  ;;  %1682 = vmatprep.subr.mxu1 %v1796_v0 }
 0x686   :  { %1683 = vmatpush3.msra.mxu1 %v1093_v48  ;;  %v1693_v52 = vpop.f32.mrf.mxu0 }
 0x687   :  { %1685 = vmatmul.mubr.msk.f32.vlgmr.msra.gmra.mxu1 %vm46_vm1, %v1871_v35  ;;  %1694 = vmatprep.subr.mxu1 %v1796_v0  ;;  %v1306_v53 = vmax.f32 %v1303_v50, 0.0 }
 0x688   :  { %1695 = vmatpush3.msra.mxu1 %v1307_v51  ;;  %1696 = vmatprep.mubr.msk.f32.mxu1 %vm1797_vm0, %v1796_v0  ;;  %v1484_v0 = vld [vmem:[#allocation5 + $0x189] ss:$0 sm:$0xff] }
 0x68b   :  { %1697 = vmatmul.mubr.msk.f32.vlgmr.msra.gmra.mxu1 %vm1313_vm4, %v1306_v53 }
 0x743   :  { %v955_v55 = vpop.f32.mrf.mxu1 }
 0x744   :  { %v956_v56 = vadd.f32 %v1481_v54, %v955_v55 }
 0x745   :  { %v1672_v58 = vpop.f32.mrf.mxu1 }
 0x746   :  { %v959_v60 = vmax.f32 %v956_v56, 0.0 }
 0x747   :  { %v1173_v61 = vpop.f32.mrf.mxu1 }
 0x748   :  { %v965_v62 = vmul.f32 %v1483_v59, %v959_v60  ;;  %v1495_v60 = vld [vmem:[#allocation5 + $0x1f0] ss:$0 sm:$0xff] }
 0x749   :  { %v1686_v63 = vpop.f32.mrf.mxu1 }
 0x74a   :  { %v966_v35 = vsel %vm46_vm1, %v965_v62, 0.0 }
 0x74b   :  { %967 = vadd.xlane.f32.xlu0 %v966_v35  ;;  %v1963_v1 = vpop.f32.mrf.mxu1 }
 0x74d   :  { %v1698_v2 = vpop.f32.mrf.mxu1 }
 0x7d4   :  { %v968_v3 = vpop.xlane.xlu0 %967 }
 0x7d5   :  { %v974_v6 = vadd.f32 %v1484_v0, %v968_v3 }
 0x7d7   :  { %981 = vperm.xlu1 %1720, %v974_v6  }
 0x852   :  { %v982_v14 = vpop.permute.xlu1 %981 }
 0x853   :  { %v988_v16 = vmul.f32 %v987_v12, %v982_v14 }
 0x855   :  { %v1056_v18 = vadd.f32 %v1055_v43, %v988_v16  ;;  %v1490_v43 = vld [vmem:[#allocation5 + $0x1c3] ss:$0 sm:$0xff] }
 0x857   :  { %v1064_v20 = vadd.f32 %v1063_v17, %v1056_v18 }
 0x859   :  { %v1070_v22 = vadd.f32 %v1069_v19, %v1064_v20 }
 0x85b   :  { %v1075_v23 = vadd.f32 %v1486_v21, %v1070_v22 }
 0x85d   :  { %v1076_v26 = vmax.f32 %v1075_v23, 0.0 }
 0x85f   :  { %v1082_v27 = vmul.f32 %v1487_v25, %v1076_v26 }
 0x861   :  { %v1083_v4 = vsel %vm46_vm1, %v1082_v27, 0.0 }
 0x862   :  { %1084 = vadd.xlane.f32.xlu1 %v1083_v4 }
 0x8eb   :  { %v1085_v29 = vpop.xlane.xlu1 %1084 }
 0x8ec   :  { %v1091_v30 = vadd.f32 %v1488_v28, %v1085_v29 }
 0x8ee   :  { %v1092_v31 = vadd.f32 %v1091_v30, %v974_v6 }
 0x8f0   :  { %1099 = vperm.xlu0 %1721, %v1092_v31  }
 0x8f4   :  { %1404 = vrot.lane.b32.xlu0 %v974_v6, %s1802_s21 }
 0x96b   :  { %v1100_v36 = vpop.permute.xlu0 %1099 }
 0x96c   :  { %v1106_v38 = vmul.f32 %v1105_v33, %v1100_v36 }
 0x96e   :  { %v1174_v40 = vadd.f32 %v1173_v61, %v1106_v38  ;;  %v1384_v61 = vadd.f32 %v1495_v60, %v1963_v1 }
 0x96f   :  { %v1405_v15 = vpop.permute.xlu0 %1404 }
 0x970   :  { %v1182_v42 = vadd.f32 %v1181_v39, %v1174_v40  ;;  %v1497_v62 = vmul.f32 -1.442695, %v1384_v61 }
 0x972   :  { %v1188_v44 = vadd.f32 %v1187_v41, %v1182_v42  ;;  %1722 = vpow2.f32 %v1497_v62 }
 0x974   :  { %v1193_v45 = vadd.f32 %v1490_v43, %v1188_v44 }
 0x976   :  { %v1194_v47 = vmax.f32 %v1193_v45, 0.0 }
 0x978   :  { %v1200_v48 = vmul.f32 %v1491_v46, %v1194_v47 }
 0x97a   :  { %v1201_v49 = vsel %vm46_vm1, %v1200_v48, 0.0 }
 0x97b   :  { %1202 = vadd.xlane.f32.xlu1 %v1201_v49 }
 0x97f   :  { %v1723_v63 = vpop.eup %1722 }
 0x980   :  { %v1390_v35 = vadd.f32 1.0, %v1723_v63 }
 0x982   :  { %1724 = vrcp.f32 %v1390_v35 }
 0x98c   :  { %1213 = vrot.lane.b32.xlu1 %v1895_v57, %s1803_s22 }
 0x98f   :  { %v1725_v3 = vpop.eup %1724 }
 0xa04   :  { %v1203_v7 = vpop.xlane.xlu1 %1202 }
 0xa05   :  { %v1209_v50 = vadd.f32 %v1492_v5, %v1203_v7 }
 0xa07   :  { %v1210_v8 = vadd.f32 %v1209_v50, %v974_v6 }
 0xa08   :  { %v1214_v51 = vpop.permute.xlu1 %1213 }
 0xa09   :  { %v1216_v52 = vsub.f32 %v1210_v8, %v1214_v51  ;;  %1411 = vrot.lane.b32.xlu0 %v1210_v8, %s1804_s23  ;;  %v1211_v11 = vsub.f32 %v1895_v57, %v1210_v8 }
 0xa0b   :  { %v1217_v53 = vmax.f32 %v1216_v52, 0.0  ;;  %v1212_v54 = vmax.f32 %v1211_v11, 0.0 }
 0xa0d   :  { %v1223_v55 = vmul.f32 0.1, %v1217_v53  ;;  %v1218_v56 = vadd.f32 %v1217_v53, %v1212_v54  ;;  %v1221_v58 = vmul.f32 0.1, %v1212_v54 }
 0xa0f   :  { %1225 = vrot.lane.b32.xlu1 %v1223_v55, %s1805_s24  ;;  %v1222_v59 = vsub.f32 %v1895_v57, %v1221_v58  ;;  %v1219_v9 = vmul.f32 0.1, %v1218_v56 }
 0xa11   :  { %v1220_v1 = vsub.f32 %v1210_v8, %v1219_v9 }
 0xa13   :  { %1401 = vrot.lane.b32.xlu1 %v1895_v57, %s1806_s25 }
 0xa17   :  { %1394 = vrot.lane.b32.xlu1 %v1222_v59, %s1805_s24 }
 0xa7b   :  { %v1412_v20 = vpop.permute.xlu0 %1411 }
 0xa81   :  { %v1226_v2 = vpop.permute.xlu1 %1225 }
 0xa82   :  { %v1228_v0 = vadd.f32 %v1226_v2, %v1895_v57 }
 0xa84   :  { %1398 = vrot.lane.b32.xlu1 %v1228_v0, %s1805_s24 }
 0xa85   :  { %v1402_v6 = vpop.permute.xlu1 %1401 }
 0xa88   :  { %1407 = vrot.lane.b32.xlu1 %v1092_v31, %s1807_s26 }
 0xa89   :  { %v1395_v10 = vpop.permute.xlu1 %1394 }
 0xa8a   :  { %v1419_v13 = vsel %vm1418_vm5, %v1220_v1, %v1395_v10 }
 0xa8c   :  { %1415 = vrot.lane.b32.xlu1 %v1218_v56, %s1795_s18 }
 0xa90   :  { %1438 = vrot.lane.b32.xlu1 %v1725_v3, %s1808_s27 }
 0xaf6   :  { %v1399_v12 = vpop.permute.xlu1 %1398 }
 0xaf7   :  { %v1421_v14 = vsel %vm1420_vm6, %v1419_v13, %v1399_v12 }
 0xaf8   :  { %v1423_v57 = vsel %vm1422_vm7, %v1421_v14, %v1402_v6 }
 0xaf9   :  { %v1425_v16 = vsel %vm1424_vm8, %v1423_v57, %v1402_v6 }
 0xafa   :  { %v1408_v17 = vpop.permute.xlu1 %1407  ;;  %v1427_v18 = vsel %vm1426_vm9, %v1425_v16, %v1405_v15 }
 0xafb   :  { %v1429_v19 = vsel %vm1428_vm10, %v1427_v18, %v1408_v17 }
 0xafc   :  { %v1431_v22 = vsel %vm1430_vm11, %v1429_v19, %v1412_v20 }
 0xafe   :  { %v1416_v21 = vpop.permute.xlu1 %1415 }
 0xaff   :  { %v1432_v23 = vsel %vm1313_vm4, %v1431_v22, %v1416_v21 }
 0xb00   :  { %1434 = vrot.lane.b32.xlu0 %v1432_v23, %s1809_s28 }
 0xb02   :  { %v1439_v26 = vpop.permute.xlu1 %1438 }
 0xb72   :  { %v1435_v25 = vpop.permute.xlu0 %1434 }
 0xb73   :  { %v1441_v27 = vsel %vm225_vm3, %v1932_v24, %v1435_v25 }
 0xb74   :  { %v1443_v4 = vsel %vm1442_vm12, %v1441_v27, %v1439_v26 }
 0xb75   :  { %v1445_v28 = vsel %vm1444_vm13, %v1443_v4, 0.0 }
 0xb76   :  { %1446 = vst [vmem:[#allocation7] sm:$0xff] %v1445_v28 }
 0xb77   :  { %1777 = shalt.err (!%p1774_p0)
}
 0xb78   :  { %1456 = dma.vmem_to_hbm [thread:$0]  %s1454_s30, 128, %s1991_s2, [#allocation4]  }
 0xb79   :  { %1790 = dma.done.wait [#allocation4], 128  }
 0xb7a   :  { %1791 = vsyncadd [#allocation4], 4294967168 }
 0xb7b   :  { %1460 = vsyncpa [#allocation3], 1 }
 0xb7c   :  { %1461 = vsyncpa [#allocation6], 1 }
 0xb7d   :  { %1462 = vsyncpa [#allocation4], 1 }

</bundles_post_ra>
